<compile_context>
chip_gen: v5e
topology: v5e:2x2
jax: 0.10.0
libtpu: 0.0.40
codegen_flags: <defaults>
</compile_context>

<pallas_src>
import numpy as np
import jax
import jax.numpy as jnp
from jax.experimental import pallas as pl
from jax.experimental.pallas import tpu as pltpu


# ---------------------------------------------------------------- pe table
def make_positional_encoding(max_len: int, d_model: int) -> np.ndarray:
    """Exact replica of the PyTorch __init__ double loop (float32 buffer)."""
    pe = np.zeros((max_len, d_model), dtype=np.float32)
    for pos in range(max_len):
        for i in range(0, d_model, 2):
            pe[pos, i] = np.sin(pos / 10000 ** (i / d_model))
            pe[pos, i + 1] = np.cos(pos / 10000 ** (i / d_model))
    return pe


# ---------------------------------------------------------------- kernel
def pos_enc_kernel(x_ref, pe_ref, o_ref):
    # x_ref:  [tb, S*D]  lane-dense activation rows for this batch tile
    # pe_ref: [1,  S*D]  pe row, broadcast over the batch/sublane axis
    o_ref[...] = x_ref[...] + pe_ref[...]


# ---------------------------------------------------------------- wrapper
def positional_encoding_forward(x: jax.Array, pe: jax.Array) -> jax.Array:
    """output = x + pe[None, :seq_len, :]  (eval semantics, no dropout)."""
    B, S, D = x.shape
    SD = S * D

    # Layout plumbing in the wrapper: present lane-dense [B, S*D] slabs to the
    # kernel (full-extent last dim -> no (8,128) divisibility issues; when
    # S*D is a multiple of 128 the stores are full-width and unmasked).
    x2d = x.reshape(B, SD)
    pe2d = jax.lax.slice(pe, (0, 0), (S, D)).reshape(1, SD)

    # Batch tiling: single block for small B; 8-row (sublane-aligned) tiles
    # for large, divisible batches so VMEM stays bounded and megacore can
    # shard the parallel axis.
    if B > 64 and B % 8 == 0:
        tb = 8
    else:
        tb = B
    grid = (B // tb,)

    out2d = pl.pallas_call(
        pos_enc_kernel,
        out_shape=jax.ShapeDtypeStruct((B, SD), x.dtype),
        grid=grid,
        in_specs=[
            pl.BlockSpec((tb, SD), lambda i: (i, 0)),   # x batch tile
            pl.BlockSpec((1, SD), lambda i: (0, 0)),    # pe row (resident)
        ],
        out_specs=pl.BlockSpec((tb, SD), lambda i: (i, 0)),
        compiler_params=pltpu.CompilerParams(
            dimension_semantics=("parallel",),
        ),
    )(x2d, pe2d)

    return out2d.reshape(B, S, D)


# ---------------------------------------------------------------- reference
def positional_encoding_reference(x: jax.Array, pe: jax.Array) -> jax.Array:
    S = x.shape[1]
    return x + pe[None, :S, :]


# ---------------------------------------------------------------- main
if __name__ == "__main__":
    D_MODEL = 32
    MAX_LEN = 16
    B, S = 2, 8

    key = jax.random.PRNGKey(0)
    x = jax.random.normal(key, (B, S, D_MODEL), dtype=jnp.float32)
    pe = jnp.asarray(make_positional_encoding(MAX_LEN, D_MODEL))

    out = jax.block_until_ready(positional_encoding_forward(x, pe))
    ref = jax.block_until_ready(positional_encoding_reference(x, pe))

    np.testing.assert_allclose(np.asarray(out), np.asarray(ref),
                               rtol=1e-6, atol=1e-6)
    print("KERNEL_OK")
</pallas_src>

<mosaic_0001>
module attributes {stable_mosaic.version = 11 : i64} {
  func.func @pos_enc_kernel(%arg0: i32, %arg1: memref<2x256xf32, #tpu.memory_space<vmem>>, %arg2: memref<1x256xf32, #tpu.memory_space<vmem>>, %arg3: memref<2x256xf32, #tpu.memory_space<vmem>>) attributes {dimension_semantics = [#tpu.dimension_semantics<parallel>], iteration_bounds = array<i64: 1>, scalar_prefetch = 0 : i64, scratch_operands = 0 : i64, tpu.core_type = #tpu.core_type<tc>, window_params = [{transform_indices = @transform_0, window_bounds = array<i64: 2, 256>}, {pipeline_mode = #tpu.pipeline_mode<synchronous>, transform_indices = @transform_1, window_bounds = array<i64: 1, 256>}, {transform_indices = @transform_2, window_bounds = array<i64: 2, 256>}]} {
    %c0 = arith.constant 0 : index
    %c0_0 = arith.constant 0 : index
    %0 = vector.load %arg1[%c0, %c0_0] : memref<2x256xf32, #tpu.memory_space<vmem>>, vector<2x256xf32>
    %c0_1 = arith.constant 0 : index
    %c0_2 = arith.constant 0 : index
    %1 = vector.load %arg2[%c0_1, %c0_2] : memref<1x256xf32, #tpu.memory_space<vmem>>, vector<1x256xf32>
    %2 = vector.broadcast %1 : vector<1x256xf32> to vector<2x256xf32>
    %3 = arith.addf %0, %2 : vector<2x256xf32>
    %c0_3 = arith.constant 0 : index
    %c0_4 = arith.constant 0 : index
    %4 = vector.load %arg3[%c0_3, %c0_4] : memref<2x256xf32, #tpu.memory_space<vmem>>, vector<2x256xf32>
    tpu.vector_store %arg3[%c0_3, %c0_4], %3 {strides = array<i32>} : memref<2x256xf32, #tpu.memory_space<vmem>>, vector<2x256xf32>,
    return
  }
  func.func @transform_0(%arg0: i32) -> (i32, i32) {
    %c0_i32 = arith.constant 0 : i32
    %c0_i32_0 = arith.constant 0 : i32
    return %arg0, %c0_i32 : i32, i32
  }
  func.func @transform_1(%arg0: i32) -> (i32, i32) {
    %c0_i32 = arith.constant 0 : i32
    %c0_i32_0 = arith.constant 0 : i32
    %c0_i32_1 = arith.constant 0 : i32
    return %c0_i32, %c0_i32_0 : i32, i32
  }
  func.func @transform_2(%arg0: i32) -> (i32, i32) {
    %c0_i32 = arith.constant 0 : i32
    %c0_i32_0 = arith.constant 0 : i32
    return %arg0, %c0_i32 : i32, i32
  }
}

</mosaic_0001>

<bundles_post_ra>
// kernel: tpu_custom_call.1
= control target key start
LH: loop header
LB: loop body
LE: loop exit
PB: predicated region body
PF: predicated region fallthrough
CT: control target
= control target key end

     0   :  { %7 = vsyncpa [#allocation3], 0  ;;  %s177_s0 = inlined_call_operand.hbm [shape: f32[2,256], index: 0, kind: input, shape index: {}]   ;;  %s178_s1 = inlined_call_operand.hbm [shape: f32[1,256], index: 1, kind: input, shape index: {}]   ;;  %s179_s2 = inlined_call_operand.hbm [shape: f32[2,256], index: 2, kind: output, shape index: {}]  }
   0x1   :  { %8 = vsyncpa [#allocation6], 0 }
   0x2   :  { %9 = vsyncpa [#allocation4], 0  ;;  %s15_s11 = sshll.u32 %s177_s0, 4  ;;  %s150_s12 = smov [#allocation2]   ;;  %s16_s11 = int_to_ptr.hbm [resolvable:$true] %s15_s11 }
   0x3   :  { %s17_s13 = sshll.u32 %s150_s12, 4  ;;  %s26_s16 = sshll.u32 %s178_s1, 4  ;;  %s18_s13 = int_to_ptr.vmem [resolvable:$true] %s17_s13  ;;  %s27_s16 = int_to_ptr.hbm [resolvable:$true] %s26_s16 }
   0x4   :  { %20 = dma.hbm_to_vmem [thread:$0]  %s16_s11, 64, %s18_s13, [#allocation3]  }
   0x5   :  { %s151_s17 = smov [#allocation5]  }
   0x6   :  { %s28_s18 = sshll.u32 %s151_s17, 4  ;;  %s29_s18 = int_to_ptr.vmem [resolvable:$true] %s28_s18 }
   0x7   :  { %31 = dma.hbm_to_vmem [thread:$0]  %s27_s16, 32, %s29_s18, [#allocation6]  }
   0x8   :  { %144 = dma.done.wait [#allocation3], 64  }
   0x9   :  { %145 = vsyncadd [#allocation3], 4294967232 }
   0xa   :  { %146 = dma.done.wait [#allocation6], 32  }
   0xb   :  { %147 = vsyncadd [#allocation6], 4294967264  ;;  %v41_v0 = vld [vmem:[#allocation5] sm:$0x3]  ;;  %vm46_vm0 = vcmask 1041408   ;;  %s152_s0 = smov [#allocation7]  }
   0xc   :  { %v43_v1 = vperm.slane %v41_v0, 0  ;;  %v44_v2 = vperm.slane %v41_v0, 1  ;;  %v40_v3 = vld [vmem:[#allocation2] sm:$0xf]  ;;  %s56_s19 = sshll.u32 %s152_s0, 4  ;;  %s58_s21 = sshll.u32 %s179_s2, 4  ;;  %s57_s19 = int_to_ptr.vmem [resolvable:$true] %s56_s19  ;;  %s59_s21 = int_to_ptr.hbm [resolvable:$true] %s58_s21 }
   0xe   :  { %v45_v4 = vrot.slane %v44_v2, 6 }
  0x10   :  { %v47_v5 = vsel %vm46_vm0, %v43_v1, %v45_v4 }
  0x11   :  { %v49_v6 = vadd.f32 %v47_v5, %v40_v3 }
  0x13   :  { %50 = vst [vmem:[#allocation7] sm:$0xf] %v49_v6 }
  0x14   :  { %61 = dma.vmem_to_hbm [thread:$0]  %s57_s19, 64, %s59_s21, [#allocation4]  }
  0x15   :  { %148 = dma.done.wait [#allocation4], 64  }
  0x16   :  { %149 = vsyncadd [#allocation4], 4294967232 }
  0x17   :  { %66 = vsyncpa [#allocation3], 1 }
  0x18   :  { %67 = vsyncpa [#allocation6], 1 }
  0x19   :  { %68 = vsyncpa [#allocation4], 1 }

</bundles_post_ra>
